<compile_context>
chip_gen: v7x
topology: tpu7x:2x2x1
jax: 0.10.0
libtpu: 0.0.40
codegen_flags: <defaults>
</compile_context>

<pallas_src>
import jax
import jax.numpy as jnp
from jax.experimental import pallas as pl
from jax.experimental.pallas import tpu as pltpu


def _round_up(v, m):
    return (v + m - 1) // m * m


def conv2d_minus_eighth(x, w, b, pad):
    """x: (1, Cin, H, W) f32, w: (Cout, Cin, KH, KW) f32, b: (Cout,) f32
       -> (1, Cout, Ho, Wo) f32  ==  Conv2d(..., padding=pad)(x) - 0.125."""
    n, cin, hh, ww = x.shape
    cout, _, kh_sz, kw_sz = w.shape
    assert n == 1
    ho = hh + 2 * pad - kh_sz + 1
    wo = ww + 2 * pad - kw_sz + 1
    hp, wp = hh + 2 * pad, ww + 2 * pad

    # "wide" output row stride = padded input row width rounded to the lane size,
    # so every kh*ws shift is 128-aligned and every patch row is a contiguous slice.
    ws = _round_up(wp, 128)
    tm = 128                                   # output lanes per m-tile
    n_m = pl.cdiv(ho * ws, tm)
    m_total = n_m * tm
    winlen = _round_up(tm + kw_sz, 128)        # window covering all kw shifts
    max_base = (n_m - 1) * tm + (kh_sz - 1) * ws
    lflat = _round_up(max(hp * ws, max_base + winlen), 128)

    # Padded input, flattened per channel with row stride `ws`, bf16, VMEM-resident.
    xp = jnp.pad(x[0], ((0, 0), (pad, pad), (pad, pad)))            # (Cin, Hp, Wp)
    xflat = jnp.pad(xp, ((0, 0), (0, 0), (0, ws - wp)))             # (Cin, Hp, WS)
    xflat = xflat.reshape(cin, hp * ws)
    xflat = jnp.pad(xflat, ((0, 0), (0, lflat - hp * ws))).astype(jnp.bfloat16)

    # Weight regrouped per kernel row kh: (KH, Cout, KW*Cin), row order kw*Cin + c.
    w3 = jnp.transpose(w, (2, 0, 3, 1)).reshape(kh_sz, cout, kw_sz * cin)
    w3 = w3.astype(jnp.bfloat16)
    # Bias with the -0.125 folded in.
    b2 = (b - 0.125).astype(jnp.float32).reshape(cout, 1)

    def kernel(x_ref, w_ref, b_ref, o_ref, patch_ref):
        i = pl.program_id(0)        # output (m) tile  -- parallel
        kh = pl.program_id(1)       # kernel row       -- reduction (last axis)

        @pl.when(kh == 0)
        def _init():
            o_ref[...] = jnp.zeros_like(o_ref)

        # 128-aligned window of the resident flat input covering all kw shifts.
        base = pl.multiple_of(i * tm + kh * ws, 128)
        win = x_ref[:, pl.ds(base, winlen)]              # (Cin, WINLEN) bf16

        # On-the-fly im2col: patch row-block kw = lane-shifted copy of the window.
        for kw in range(kw_sz):                          # static, fully unrolled
            patch_ref[kw * cin:(kw + 1) * cin, :] = win[:, kw:kw + tm]

        # (Cout, KW*Cin) @ (KW*Cin, TM) on the MXU, f32 accumulation into o_ref.
        o_ref[...] += jnp.dot(w_ref[0], patch_ref[...],
                              preferred_element_type=jnp.float32)

        @pl.when(kh == pl.num_programs(1) - 1)
        def _finalize():
            o_ref[...] += b_ref[...]                     # fused bias and -0.125

    out_wide = pl.pallas_call(
        kernel,
        out_shape=jax.ShapeDtypeStruct((cout, m_total), jnp.float32),
        grid_spec=pltpu.PrefetchScalarGridSpec(
            num_scalar_prefetch=0,
            grid=(n_m, kh_sz),
            in_specs=[
                pl.BlockSpec((cin, lflat), lambda i, k: (0, 0)),      # resident input
                pl.BlockSpec((1, cout, kw_sz * cin), lambda i, k: (k, 0, 0)),
                pl.BlockSpec((cout, 1), lambda i, k: (0, 0)),
            ],
            out_specs=pl.BlockSpec((cout, tm), lambda i, k: (0, i)),
            scratch_shapes=[pltpu.VMEM((kw_sz * cin, tm), jnp.bfloat16)],
        ),
        compiler_params=pltpu.CompilerParams(
            dimension_semantics=("parallel", "arbitrary"),
            vmem_limit_bytes=32 * 1024 * 1024,
        ),
    )(xflat, w3, b2)

    # Slice the valid lanes out of the wide result; reshapes straight to NCHW
    # (no transpose needed since the output is already (Cout, pixels)).
    out = out_wide[:, :ho * ws].reshape(cout, ho, ws)[:, :, :wo]
    return out[None]


if __name__ == "__main__":
    # Small shapes consistent with the module's structure
    # (kernel size == input spatial size, padding < kernel size).
    N, Cin, H, W = 1, 8, 16, 16
    Cout, KH, KW, PAD = 8, 16, 16, 4

    key = jax.random.PRNGKey(0)
    kx, kw_, kb = jax.random.split(key, 3)

    x = jax.random.normal(kx, (N, Cin, H, W), dtype=jnp.float32)

    # Deterministic Conv2d-style init (uniform +/- 1/sqrt(fan_in)).
    fan_in = Cin * KH * KW
    bound = 1.0 / (fan_in ** 0.5)
    w = jax.random.uniform(kw_, (Cout, Cin, KH, KW), jnp.float32, -bound, bound)
    b = jax.random.uniform(kb, (Cout,), jnp.float32, -bound, bound)

    out = conv2d_minus_eighth(x, w, b, PAD)
    out = jax.block_until_ready(out)

    # Reference: f32 conv on the same bf16-rounded operands (the kernel uses
    # bf16 inputs with exact f32 MXU accumulation).
    xq = x.astype(jnp.bfloat16).astype(jnp.float32)
    wq = w.astype(jnp.bfloat16).astype(jnp.float32)
    ref = jax.lax.conv_general_dilated(
        xq, wq, window_strides=(1, 1), padding=[(PAD, PAD), (PAD, PAD)],
        dimension_numbers=("NCHW", "OIHW", "NCHW"),
        precision=jax.lax.Precision.HIGHEST,
    ) + b[None, :, None, None] - 0.125
    ref = jax.block_until_ready(ref)

    Ho = H + 2 * PAD - KH + 1
    Wo = W + 2 * PAD - KW + 1
    assert out.shape == (N, Cout, Ho, Wo)
    assert jnp.allclose(out, ref, rtol=1e-2, atol=1e-2), float(
        jnp.max(jnp.abs(out - ref)))

    print("KERNEL_OK")
</pallas_src>

<mosaic_0001>
module attributes {stable_mosaic.version = 11 : i64} {
  func.func @kernel(%arg0: i32, %arg1: i32, %arg2: memref<8x3200xbf16, #tpu.memory_space<vmem>>, %arg3: memref<1x8x128xbf16, #tpu.memory_space<vmem>>, %arg4: memref<8x1xf32, #tpu.memory_space<vmem>>, %arg5: memref<8x128xf32, #tpu.memory_space<vmem>>, %arg6: memref<128x128xbf16, #tpu.memory_space<vmem>>) attributes {dimension_semantics = [#tpu.dimension_semantics<parallel>, #tpu.dimension_semantics<arbitrary>], iteration_bounds = array<i64: 9, 16>, scalar_prefetch = 0 : i64, scratch_operands = 1 : i64, tpu.core_type = #tpu.core_type<tc>, window_params = [{pipeline_mode = #tpu.pipeline_mode<synchronous>, transform_indices = @transform_0, window_bounds = array<i64: 8, 3200>}, {transform_indices = @transform_1, window_bounds = array<i64: 1, 8, 128>}, {pipeline_mode = #tpu.pipeline_mode<synchronous>, transform_indices = @transform_2, window_bounds = array<i64: 8, 1>}, {transform_indices = @transform_3, window_bounds = array<i64: 8, 128>}]} {
    %c0_i32 = arith.constant 0 : i32
    %0 = arith.cmpi eq, %arg1, %c0_i32 : i32
    %1 = arith.extui %0 : i1 to i32
    %c0_i32_0 = arith.constant 0 : i32
    %2 = arith.cmpi ne, %1, %c0_i32_0 : i32
    scf.if %2 {
      %cst_29 = arith.constant 0.000000e+00 : f32
      %51 = vector.broadcast %cst_29 : f32 to vector<8x128xf32>
      %c0_30 = arith.constant 0 : index
      %c0_31 = arith.constant 0 : index
      %52 = vector.load %arg5[%c0_30, %c0_31] : memref<8x128xf32, #tpu.memory_space<vmem>>, vector<8x128xf32>
      tpu.vector_store %arg5[%c0_30, %c0_31], %51 {strides = array<i32>} : memref<8x128xf32, #tpu.memory_space<vmem>>, vector<8x128xf32>,
    } else {
    }
    %c128_i32 = arith.constant 128 : i32
    %3 = arith.muli %arg0, %c128_i32 : i32
    %c128_i32_1 = arith.constant 128 : i32
    %4 = arith.muli %arg1, %c128_i32_1 : i32
    %5 = arith.addi %3, %4 : i32
    %6 = tpu.assume_multiple %5, 128 : i32
    %c0 = arith.constant 0 : index
    %7 = arith.index_cast %6 : i32 to index
    %8 = vector.load %arg2[%c0, %7] : memref<8x3200xbf16, #tpu.memory_space<vmem>>, vector<8x256xbf16>
    %9 = vector.extract_strided_slice %8 {offsets = [0, 0], sizes = [8, 128], strides = [1, 1]} : vector<8x256xbf16> to vector<8x128xbf16>
    %c0_2 = arith.constant 0 : index
    %c0_3 = arith.constant 0 : index
    %10 = vector.load %arg6[%c0_2, %c0_3] : memref<128x128xbf16, #tpu.memory_space<vmem>>, vector<8x128xbf16>
    tpu.vector_store %arg6[%c0_2, %c0_3], %9 {strides = array<i32>} : memref<128x128xbf16, #tpu.memory_space<vmem>>, vector<8x128xbf16>,
    %11 = vector.extract_strided_slice %8 {offsets = [0, 1], sizes = [8, 128], strides = [1, 1]} : vector<8x256xbf16> to vector<8x128xbf16>
    %c8 = arith.constant 8 : index
    %c0_4 = arith.constant 0 : index
    %12 = vector.load %arg6[%c8, %c0_4] : memref<128x128xbf16, #tpu.memory_space<vmem>>, vector<8x128xbf16>
    tpu.vector_store %arg6[%c8, %c0_4], %11 {strides = array<i32>} : memref<128x128xbf16, #tpu.memory_space<vmem>>, vector<8x128xbf16>,
    %13 = vector.extract_strided_slice %8 {offsets = [0, 2], sizes = [8, 128], strides = [1, 1]} : vector<8x256xbf16> to vector<8x128xbf16>
    %c16 = arith.constant 16 : index
    %c0_5 = arith.constant 0 : index
    %14 = vector.load %arg6[%c16, %c0_5] : memref<128x128xbf16, #tpu.memory_space<vmem>>, vector<8x128xbf16>
    tpu.vector_store %arg6[%c16, %c0_5], %13 {strides = array<i32>} : memref<128x128xbf16, #tpu.memory_space<vmem>>, vector<8x128xbf16>,
    %15 = vector.extract_strided_slice %8 {offsets = [0, 3], sizes = [8, 128], strides = [1, 1]} : vector<8x256xbf16> to vector<8x128xbf16>
    %c24 = arith.constant 24 : index
    %c0_6 = arith.constant 0 : index
    %16 = vector.load %arg6[%c24, %c0_6] : memref<128x128xbf16, #tpu.memory_space<vmem>>, vector<8x128xbf16>
    tpu.vector_store %arg6[%c24, %c0_6], %15 {strides = array<i32>} : memref<128x128xbf16, #tpu.memory_space<vmem>>, vector<8x128xbf16>,
    %17 = vector.extract_strided_slice %8 {offsets = [0, 4], sizes = [8, 128], strides = [1, 1]} : vector<8x256xbf16> to vector<8x128xbf16>
    %c32 = arith.constant 32 : index
    %c0_7 = arith.constant 0 : index
    %18 = vector.load %arg6[%c32, %c0_7] : memref<128x128xbf16, #tpu.memory_space<vmem>>, vector<8x128xbf16>
    tpu.vector_store %arg6[%c32, %c0_7], %17 {strides = array<i32>} : memref<128x128xbf16, #tpu.memory_space<vmem>>, vector<8x128xbf16>,
    %19 = vector.extract_strided_slice %8 {offsets = [0, 5], sizes = [8, 128], strides = [1, 1]} : vector<8x256xbf16> to vector<8x128xbf16>
    %c40 = arith.constant 40 : index
    %c0_8 = arith.constant 0 : index
    %20 = vector.load %arg6[%c40, %c0_8] : memref<128x128xbf16, #tpu.memory_space<vmem>>, vector<8x128xbf16>
    tpu.vector_store %arg6[%c40, %c0_8], %19 {strides = array<i32>} : memref<128x128xbf16, #tpu.memory_space<vmem>>, vector<8x128xbf16>,
    %21 = vector.extract_strided_slice %8 {offsets = [0, 6], sizes = [8, 128], strides = [1, 1]} : vector<8x256xbf16> to vector<8x128xbf16>
    %c48 = arith.constant 48 : index
    %c0_9 = arith.constant 0 : index
    %22 = vector.load %arg6[%c48, %c0_9] : memref<128x128xbf16, #tpu.memory_space<vmem>>, vector<8x128xbf16>
    tpu.vector_store %arg6[%c48, %c0_9], %21 {strides = array<i32>} : memref<128x128xbf16, #tpu.memory_space<vmem>>, vector<8x128xbf16>,
    %23 = vector.extract_strided_slice %8 {offsets = [0, 7], sizes = [8, 128], strides = [1, 1]} : vector<8x256xbf16> to vector<8x128xbf16>
    %c56 = arith.constant 56 : index
    %c0_10 = arith.constant 0 : index
    %24 = vector.load %arg6[%c56, %c0_10] : memref<128x128xbf16, #tpu.memory_space<vmem>>, vector<8x128xbf16>
    tpu.vector_store %arg6[%c56, %c0_10], %23 {strides = array<i32>} : memref<128x128xbf16, #tpu.memory_space<vmem>>, vector<8x128xbf16>,
    %25 = vector.extract_strided_slice %8 {offsets = [0, 8], sizes = [8, 128], strides = [1, 1]} : vector<8x256xbf16> to vector<8x128xbf16>
    %c64 = arith.constant 64 : index
    %c0_11 = arith.constant 0 : index
    %26 = vector.load %arg6[%c64, %c0_11] : memref<128x128xbf16, #tpu.memory_space<vmem>>, vector<8x128xbf16>
    tpu.vector_store %arg6[%c64, %c0_11], %25 {strides = array<i32>} : memref<128x128xbf16, #tpu.memory_space<vmem>>, vector<8x128xbf16>,
    %27 = vector.extract_strided_slice %8 {offsets = [0, 9], sizes = [8, 128], strides = [1, 1]} : vector<8x256xbf16> to vector<8x128xbf16>
    %c72 = arith.constant 72 : index
    %c0_12 = arith.constant 0 : index
    %28 = vector.load %arg6[%c72, %c0_12] : memref<128x128xbf16, #tpu.memory_space<vmem>>, vector<8x128xbf16>
    tpu.vector_store %arg6[%c72, %c0_12], %27 {strides = array<i32>} : memref<128x128xbf16, #tpu.memory_space<vmem>>, vector<8x128xbf16>,
    %29 = vector.extract_strided_slice %8 {offsets = [0, 10], sizes = [8, 128], strides = [1, 1]} : vector<8x256xbf16> to vector<8x128xbf16>
    %c80 = arith.constant 80 : index
    %c0_13 = arith.constant 0 : index
    %30 = vector.load %arg6[%c80, %c0_13] : memref<128x128xbf16, #tpu.memory_space<vmem>>, vector<8x128xbf16>
    tpu.vector_store %arg6[%c80, %c0_13], %29 {strides = array<i32>} : memref<128x128xbf16, #tpu.memory_space<vmem>>, vector<8x128xbf16>,
    %31 = vector.extract_strided_slice %8 {offsets = [0, 11], sizes = [8, 128], strides = [1, 1]} : vector<8x256xbf16> to vector<8x128xbf16>
    %c88 = arith.constant 88 : index
    %c0_14 = arith.constant 0 : index
    %32 = vector.load %arg6[%c88, %c0_14] : memref<128x128xbf16, #tpu.memory_space<vmem>>, vector<8x128xbf16>
    tpu.vector_store %arg6[%c88, %c0_14], %31 {strides = array<i32>} : memref<128x128xbf16, #tpu.memory_space<vmem>>, vector<8x128xbf16>,
    %33 = vector.extract_strided_slice %8 {offsets = [0, 12], sizes = [8, 128], strides = [1, 1]} : vector<8x256xbf16> to vector<8x128xbf16>
    %c96 = arith.constant 96 : index
    %c0_15 = arith.constant 0 : index
    %34 = vector.load %arg6[%c96, %c0_15] : memref<128x128xbf16, #tpu.memory_space<vmem>>, vector<8x128xbf16>
    tpu.vector_store %arg6[%c96, %c0_15], %33 {strides = array<i32>} : memref<128x128xbf16, #tpu.memory_space<vmem>>, vector<8x128xbf16>,
    %35 = vector.extract_strided_slice %8 {offsets = [0, 13], sizes = [8, 128], strides = [1, 1]} : vector<8x256xbf16> to vector<8x128xbf16>
    %c104 = arith.constant 104 : index
    %c0_16 = arith.constant 0 : index
    %36 = vector.load %arg6[%c104, %c0_16] : memref<128x128xbf16, #tpu.memory_space<vmem>>, vector<8x128xbf16>
    tpu.vector_store %arg6[%c104, %c0_16], %35 {strides = array<i32>} : memref<128x128xbf16, #tpu.memory_space<vmem>>, vector<8x128xbf16>,
    %37 = vector.extract_strided_slice %8 {offsets = [0, 14], sizes = [8, 128], strides = [1, 1]} : vector<8x256xbf16> to vector<8x128xbf16>
    %c112 = arith.constant 112 : index
    %c0_17 = arith.constant 0 : index
    %38 = vector.load %arg6[%c112, %c0_17] : memref<128x128xbf16, #tpu.memory_space<vmem>>, vector<8x128xbf16>
    tpu.vector_store %arg6[%c112, %c0_17], %37 {strides = array<i32>} : memref<128x128xbf16, #tpu.memory_space<vmem>>, vector<8x128xbf16>,
    %39 = vector.extract_strided_slice %8 {offsets = [0, 15], sizes = [8, 128], strides = [1, 1]} : vector<8x256xbf16> to vector<8x128xbf16>
    %c120 = arith.constant 120 : index
    %c0_18 = arith.constant 0 : index
    %40 = vector.load %arg6[%c120, %c0_18] : memref<128x128xbf16, #tpu.memory_space<vmem>>, vector<8x128xbf16>
    tpu.vector_store %arg6[%c120, %c0_18], %39 {strides = array<i32>} : memref<128x128xbf16, #tpu.memory_space<vmem>>, vector<8x128xbf16>,
    %c0_19 = arith.constant 0 : index
    %c0_20 = arith.constant 0 : index
    %41 = vector.load %arg5[%c0_19, %c0_20] : memref<8x128xf32, #tpu.memory_space<vmem>>, vector<8x128xf32>
    %c0_21 = arith.constant 0 : index
    %c0_22 = arith.constant 0 : index
    %c0_23 = arith.constant 0 : index
    %42 = vector.load %arg3[%c0_21, %c0_22, %c0_23] : memref<1x8x128xbf16, #tpu.memory_space<vmem>>, vector<1x8x128xbf16>
    %43 = vector.shape_cast %42 : vector<1x8x128xbf16> to vector<8x128xbf16>
    %c0_24 = arith.constant 0 : index
    %c0_25 = arith.constant 0 : index
    %44 = vector.load %arg6[%c0_24, %c0_25] : memref<128x128xbf16, #tpu.memory_space<vmem>>, vector<128x128xbf16>
    %cst = arith.constant dense<0.000000e+00> : vector<8x128xf32>
    %45 = tpu.matmul %43, %44, %cst {dimension_numbers = #tpu.dot_dimension_numbers<[1], [0], [0], [1], [0, 0, 1, 1], [], []>} : vector<8x128xbf16>, vector<128x128xbf16>, vector<8x128xf32> -> vector<8x128xf32>
    %46 = arith.addf %41, %45 : vector<8x128xf32>
    %c0_26 = arith.constant 0 : index
    %c0_27 = arith.constant 0 : index
    %47 = vector.load %arg5[%c0_26, %c0_27] : memref<8x128xf32, #tpu.memory_space<vmem>>, vector<8x128xf32>
    tpu.vector_store %arg5[%c0_26, %c0_27], %46 {strides = array<i32>} : memref<8x128xf32, #tpu.memory_space<vmem>>, vector<8x128xf32>,
    %c15_i32 = arith.constant 15 : i32
    %48 = arith.cmpi eq, %arg1, %c15_i32 : i32
    %49 = arith.extui %48 : i1 to i32
    %c0_i32_28 = arith.constant 0 : i32
    %50 = arith.cmpi ne, %49, %c0_i32_28 : i32
    scf.if %50 {
      %c0_29 = arith.constant 0 : index
      %c0_30 = arith.constant 0 : index
      %51 = vector.load %arg5[%c0_29, %c0_30] : memref<8x128xf32, #tpu.memory_space<vmem>>, vector<8x128xf32>
      %c0_31 = arith.constant 0 : index
      %c0_32 = arith.constant 0 : index
      %52 = vector.load %arg4[%c0_31, %c0_32] : memref<8x1xf32, #tpu.memory_space<vmem>>, vector<8x1xf32>
      %53 = vector.broadcast %52 : vector<8x1xf32> to vector<8x128xf32>
      %54 = arith.addf %51, %53 : vector<8x128xf32>
      %c0_33 = arith.constant 0 : index
      %c0_34 = arith.constant 0 : index
      %55 = vector.load %arg5[%c0_33, %c0_34] : memref<8x128xf32, #tpu.memory_space<vmem>>, vector<8x128xf32>
      tpu.vector_store %arg5[%c0_33, %c0_34], %54 {strides = array<i32>} : memref<8x128xf32, #tpu.memory_space<vmem>>, vector<8x128xf32>,
    } else {
    }
    return
  }
  func.func @transform_0(%arg0: i32, %arg1: i32) -> (i32, i32) {
    %c0_i32 = arith.constant 0 : i32
    %c0_i32_0 = arith.constant 0 : i32
    %c0_i32_1 = arith.constant 0 : i32
    return %c0_i32, %c0_i32_0 : i32, i32
  }
  func.func @transform_1(%arg0: i32, %arg1: i32) -> (i32, i32, i32) {
    %c0_i32 = arith.constant 0 : i32
    %c0_i32_0 = arith.constant 0 : i32
    %c0_i32_1 = arith.constant 0 : i32
    return %arg1, %c0_i32, %c0_i32_0 : i32, i32, i32
  }
  func.func @transform_2(%arg0: i32, %arg1: i32) -> (i32, i32) {
    %c0_i32 = arith.constant 0 : i32
    %c0_i32_0 = arith.constant 0 : i32
    %c0_i32_1 = arith.constant 0 : i32
    return %c0_i32, %c0_i32_0 : i32, i32
  }
  func.func @transform_3(%arg0: i32, %arg1: i32) -> (i32, i32) {
    %c0_i32 = arith.constant 0 : i32
    %c0_i32_0 = arith.constant 0 : i32
    return %c0_i32, %arg0 : i32, i32
  }
}

</mosaic_0001>

<bundles_post_ra>
// kernel: tpu_custom_call.1
= control target key start
LH: loop header
LB: loop body
LE: loop exit
PB: predicated region body
PF: predicated region fallthrough
CT: control target
= control target key end

     0   :  { %s1224_s0 = inlined_call_operand.hbm [shape: bf16[8,3200], index: 0, kind: input, shape index: {}]   ;;  %s1225_s1 = inlined_call_operand.hbm [shape: bf16[16,8,128], index: 1, kind: input, shape index: {}]   ;;  %s1226_s2 = inlined_call_operand.vmem [shape: f32[8,1], index: 2, kind: input, shape index: {}]   ;;  %s1227_s3 = inlined_call_operand.hbm [shape: f32[8,1152], index: 3, kind: output, shape index: {}]  }
   0x1   :  { %1236 = sst [smem:[#allocation15_spill]] %s1224_s0 }
   0x2   :  { %8 = vsyncpa [#allocation4], 0 }
   0x3   :  { %9 = vsyncpa [#allocation7], 0 }
   0x4   :  { %11 = vsyncpa [#allocation7 + $0x1], 0 }
   0x5   :  { %12 = vsyncpa [#allocation5], 0 }
   0x6   :  { %14 = vsyncpa [#allocation5 + $0x1], 0  ;;  %s939_s12 = smov 0   ;;  %s941_s13 = smov 0  }
   0x7   :  { %s943_s14 = smov 0   ;;  %s945_s15 = smov 0  }
   0x8   :  { %s947_s16 = smov 0   ;;  %s949_s17 = smov 0  }
   0x9   :  { %s951_s18 = smov 0   ;;  %s953_s19 = smov 0  }
   0xa   :  { %s955_s20 = smov 0   ;;  %s957_s21 = smov 0  }
   0xb   :  { %s959_s22 = smov 0  }
   0xc LB: > { %s525_s23 = sadd.s32 4294967295, %s895_s22   ;;  %s526_s24 = sadd.s32 4294967294, %s895_s22   ;;  %s895_s22 = sphi %s959_s22, %s20_s22   ;;  %s891_s21 = sphi %s957_s21, %s1266_s21   ;;  %s887_s20 = sphi %s955_s20, %s1265_s20   ;;  %s883_s19 = sphi %s953_s19, %s1264_s19   ;;  %s879_s18 = sphi %s951_s18, %s1263_s18   ;;  %s875_s17 = sphi %s949_s17, %s1262_s17   ;;  %s871_s16 = sphi %s947_s16, %s1261_s16   ;;  %s867_s15 = sphi %s945_s15, %s1260_s15   ;;  %s863_s14 = sphi %s943_s14, %s1259_s14   ;;  %s859_s13 = sphi %s941_s13, %s1258_s13   ;;  %s855_s12 = sphi %s939_s12, %s1257_s12  }
   0xd   : > { %p73_p0 = scmp.ne.s32.totalorder %s871_s16, %s867_s15  ;;  %p995_p1 = scmp.eq.s32.totalorder %s525_s23, 0 }
   0xe   : > { %s107_s26 = sadd.s32 1, %s863_s14  ;;  %p117_p2 = scmp.ne.s32.totalorder %s863_s14, %s859_s13 }
   0xf   : > { %s1237_s25 = scalar_select %p995_p1, 1, 0 }
  0x10   : > { %p1004_p3 = por %p995_p1, %p73_p0  ;;  %p118_p4 = scmp.eq.s32.totalorder %s525_s23, 143 }
  0x11   : > { %p123_p5 = scmp.ne.s32.totalorder %s859_s13, %s855_s12  ;;  %p124_p6 = scmp.eq.s32.totalorder %s526_s24, 143 }
  0x12   : > { %s1238_s27 = scalar_select %p1004_p3, 1, 0 }
  0x13   : > { %p1010_p7 = por %p118_p4, %p117_p2  ;;  %p527_p8 = scmp.ge.s32.totalorder %s895_s22, 1 }
  0x14   : > { %p1015_p9 = por %p124_p6, %p123_p5  ;;  %p131_p10 = scmp.lt.s32.totalorder %s895_s22, 145 }
  0x15   : > { %s1239_s28 = scalar_select %p1010_p7, 1, 0 }
  0x16   : > { %s1240_s29 = scalar_select %p1015_p9, 1, 0 }
  0x17   : > { %p1020_p11 = pnand %p527_p8, %p131_p10  ;;  %s897_s4 = smov [#allocation3]  }
  0x18   : > { %1241 = sst [smem:[#allocation12_spill]] %s1240_s29  ;;  %s144_s5 = sshll.u32 %s897_s4, 4  ;;  %s145_s5 = int_to_ptr.vmem [resolvable:$true] %s144_s5 }
  0x19   : > { %s1242_s30 = scalar_select %p1020_p11, 1, 0 }
  0x1a   : > { %p584_p12 = pneg %p1020_p11  ;;  %s29_s7 = sadd.s32 1, %s887_s20 }
  0x1b   : > { %s1244_s0 = sld [smem:[#allocation15_spill]] }
  0x1c   : > { %p1028_p13 = pnand %p584_p12, %p995_p1 }
  0x1e   : > { %p713_p2 = pneg %p1028_p13 }
  0x21   : > { %s711_s10 = scalar_lea.hbm %s1244_s0, 1600 }
  0x22   : > { %p712_p0 = scmp.ne.s32.totalorder %s1244_s0, %s711_s10  ;;  %p718_p6 = scmp.lt.u32.totalorder %s711_s10, %s1244_s0 }
  0x24   : > { %p714_p4 = pnand %p713_p2, %p712_p0 }
  0x26   : > { %p715_p5 = pneg %p714_p4 }
  0x28   : > { %p720_p8 = pnand %p718_p6, %p715_p5 }
  0x2a   : > { %723 = shalt.err (!%p720_p8)
}
  0x2b   : > { %s724_s4 = scalar_lea.vmem %s145_s5, 1600  ;;  %p732_p7 = scmp.lt.s32.totalorder %s145_s5, %s145_s5 }
  0x2c   : > { %p725_p10 = scmp.ne.s32.totalorder %s145_s5, %s724_s4  ;;  %p733_p3 = scmp.lt.s32.totalorder %s724_s4, %s724_s4 }
  0x2e   : > { %p727_p12 = pnand %p725_p10, %p713_p2  ;;  %p734_p1 = por %p733_p3, %p732_p7 }
  0x30   : > { %p728_p9 = pneg %p727_p12 }
  0x32   : > { %p735_p11 = pnand %p734_p1, %p728_p9 }
  0x34   : > { %738 = shalt.err (!%p735_p11)
}
  0x35   : > { %587 = dma.hbm_to_vmem [thread:$0]  (!%p1028_p13), %s1244_s0, 1600, %s145_s5, [#allocation4]  }
  0x36   : > { %p30_p3 = scmp.ge.s32.totalorder %s29_s7, 16  ;;  %s32_s10 = sadd.s32 1, %s891_s21 }
  0x37   : > { %s60_s11 = sadd.s32 1, %s875_s17  ;;  %p67_p1 = scmp.ne.s32.totalorder %s875_s17, %s871_s16 }
  0x38   : > { %s1268_s7 = smov (%p30_p3, %s29_s7), 0  ;;  %s1270_s10 = smov (!%p30_p3, %s32_s10), %s891_s21 }
  0x39   : > { %1245 = sst [smem:[#allocation13_spill]] %s1268_s7  ;;  %s57_s6 = ssub.s32 %s887_s20, %s1268_s7 }
  0x3a   : > { %p68_p7 = scmp.eq.s32.totalorder %s895_s22, 0  ;;  %p34_p9 = scmp.ge.s32.totalorder %s1270_s10, 9 }
  0x3b   : > { %p58_p11 = scmp.eq.s32.totalorder %s57_s6, 0  ;;  %p597_p13 = scmp.lt.s32.totalorder %s895_s22, 144 }
  0x3c   : > { %p1059_p0 = por %p68_p7, %p67_p1  ;;  %s1272_s10 = smov (%p34_p9, %s1270_s10), 0 }
  0x3d   : > { %1247 = sst [smem:[#allocation14_spill]] %s1272_s10  ;;  %s104_s23 = ssub.s32 %s891_s21, %s1272_s10 }
  0x3e   : > { %s1067_s5 = scalar_select %p58_p11, %s875_s17, %s60_s11  }
  0x3f   : > { %s158_s24 = sand.u32 1, %s875_s17   ;;  %p105_p2 = scmp.eq.s32.totalorder %s104_s23, 0 }
  0x40   : > { %s530_s4 = sshll.u32 %s158_s24, 2  ;;  %s531_s8 = sshll.u32 %s887_s20, 6 }
  0x41   : > { %s1076_s9 = scalar_select %p105_p2, %s863_s14, %s107_s26  }
  0x42   : > { %s1081_s7 = scalar_lea.hbm %s1225_s1, %s531_s8  ;;  %s162_s29 = scalar_lea.vmem [#allocation6], %s530_s4 }
  0x43   : > { %s169_s11 = sshll.u32 %s162_s29, 4  ;;  %p1085_p4 = pnand %p597_p13, %p1059_p0  ;;  %s1089_s11 = int_to_ptr.vmem [resolvable:$true] %s169_s11 }
  0x44   : > { %s159_s26 = scalar_lea.sflag [#allocation7], %s158_s24  ;;  %s739_s23 = scalar_lea.hbm %s1081_s7, 64 }
  0x45   : > { %p740_p5 = scmp.ne.s32.totalorder %s1081_s7, %s739_s23  ;;  %p741_p6 = pneg %p1085_p4 }
  0x46   : > { %s744_s15 = scalar_lea.hbm %s1225_s1, 1024  ;;  %p745_p12 = scmp.lt.u32.totalorder %s1081_s7, %s1225_s1 }
  0x47   : > { %p742_p8 = pnand %p741_p6, %p740_p5  ;;  %p746_p3 = scmp.lt.u32.totalorder %s744_s15, %s739_s23 }
  0x48   : > { %p748_p7 = scmp.lt.u32.totalorder %s739_s23, %s1081_s7 }
  0x49   : > { %p743_p10 = pneg %p742_p8  ;;  %p747_p1 = por %p746_p3, %p745_p12 }
  0x4b   : > { %p749_p9 = por %p748_p7, %p747_p1 }
  0x4d   : > { %p750_p11 = pnand %p749_p9, %p743_p10 }
  0x4f   : > { %753 = shalt.err (!%p750_p11)
}
  0x50   : > { %s754_s24 = scalar_lea.vmem %s1089_s11, 64  ;;  %s898_s6 = smov [#allocation6]  }
  0x51   : > { %p755_p0 = scmp.ne.s32.totalorder %s1089_s11, %s754_s24  ;;  %s759_s0 = sshll.u32 %s898_s6, 4  ;;  %s760_s0 = int_to_ptr.vmem [resolvable:$false] %s759_s0 }
  0x52   : > { %s761_s29 = scalar_lea.vmem %s760_s0, 128  ;;  %p762_p5 = scmp.lt.s32.totalorder %s1089_s11, %s760_s0 }
  0x53   : > { %p757_p13 = pnand %p755_p0, %p741_p6  ;;  %p763_p8 = scmp.lt.s32.totalorder %s761_s29, %s754_s24 }
  0x55   : > { %p758_p2 = pneg %p757_p13  ;;  %p764_p12 = por %p763_p8, %p762_p5 }
  0x57   : > { %p765_p3 = pnand %p764_p12, %p758_p2 }
  0x59   : > { %768 = shalt.err (!%p765_p3)
}
  0x5a   : > { %591 = dma.hbm_to_vmem [thread:$0]  (!%p1085_p4), %s1081_s7, 64, %s1089_s11, %s159_s26  }
  0x5b   : > { %p1249_p10 = scmp.ne.s32.totalorder %s1242_s30, 0 }
  0x5c   : > { %p1250_p6 = scmp.ne.s32.totalorder (!%p1249_p10), %s1237_s25, 0 }
  0x5d   : > { %178 = sbr.rel (%p1249_p10) target bundleno = 555 (0x22b), region = 32 }
  0x64   : > { %842 = dma.done.wait (%p1250_p6), [#allocation4], 1600  }
  0x65   : > { %844 = vsyncadd (%p1250_p6), [#allocation4], 4294965696  ;;  %s184_s23 = sand.u32 1, %s871_s16   ;;  %p1251_p1 = scmp.ne.s32.totalorder %s1238_s27, 0 }
  0x66   : > { %s1123_s15 = sshll.u32 %s184_s23, 2  ;;  %s185_s4 = scalar_lea.sflag [#allocation7], %s184_s23 }
  0x67   : > { %s188_s10 = scalar_lea.vmem [#allocation6], %s1123_s15 }
  0x68   : > { %846 = dma.done.wait (%p1251_p1), %s185_s4, 64  }
  0x69   : > { %848 = vsyncadd (%p1251_p1), %s185_s4, 4294967232  ;;  %s208_s30 = sand.u32 1, %s859_s13   ;;  %p536_p4 = scmp.ne.s32.totalorder %s879_s18, 0 }
  0x6a   : > { %s535_s7 = sshll.u32 %s208_s30, 3  ;;  %v899_v0 = vmov (!%p536_p4), 0.0  }
  0x6b   : > { %s1133_s25 = scalar_lea.vmem [#allocation8], %s535_s7  ;;  %215 = sbr.rel (%p536_p4) target bundleno = 114 (0x72), region = 44 }
  0x6c   : > { %216 = vst [vmem:[%s1133_s25] sm:$0xff] (!%p536_p4), %v899_v0 }
  0x72 PF: > { %s537_s11 = sshll.u32 %s883_s19, 7  ;;  %s538_s27 = sshll.u32 %s879_s18, 7  ;;  %v900_v3 = vmov 0.0   ;;  %vm915_vm0 = vmmov 0   ;;  %vm243_vm1 = vcmask 1031168   ;;  %vm235_vm2 = vcmask 1039360  }
  0x73   : > { %s219_s26 = sadd.s32 %s538_s27, %s537_s11  ;;  %556 = vmatprep.subr.bf16.mxu0 %v900_v3  ;;  %s901_s0 = smov 126   ;;  %572 = vmatprep.mubr.msk.bf16.mxu0 %vm915_vm0, %v900_v3  ;;  %vm251_vm3 = vcmask 1022976   ;;  %vm259_vm4 = vcmask 1014784   ;;  %vm267_vm5 = vcmask 1006592   ;;  %vm275_vm6 = vcmask 998400   ;;  %v351_v59 = vld [vmem:[%s1133_s25] sm:$0xff] }
  0x74   : > { %s220_s8 = sshra.s32 %s219_s26, 7  ;;  %s902_s29 = smov 127   ;;  %vm283_vm7 = vcmask 990208   ;;  %vm291_vm8 = vcmask 982016   ;;  %vm299_vm9 = vcmask 973824   ;;  %vm307_vm10 = vcmask 965632  }
  0x75   : > { %s539_s24 = sshll.u32 %s220_s8, 2  ;;  %s903_s23 = smov 125   ;;  %vm315_vm11 = vcmask 957440   ;;  %vm323_vm12 = vcmask 949248   ;;  %vm331_vm13 = vcmask 941056   ;;  %vm339_vm14 = vcmask 932864  }
  0x76   : > { %s223_s6 = scalar_lea.vmem [#allocation3], %s539_s24  ;;  %s904_s4 = smov 124   ;;  %vm347_vm15 = vcmask 924672   ;;  %v352_v58 = vld [vmem:[%s188_s10] sm:$0xf] }
  0x77   : > { %v224_v1 = vld [vmem:[%s223_s6] sm:$0xff]  ;;  %s905_s7 = smov 123   ;;  %s906_s27 = smov 122  }
  0x78   : > { %v540_v2 = vcombine.low %v224_v1, %v224_v1  ;;  %225 = vst [vmem:[#allocation2] sm:$0xf] %v224_v1  ;;  %v541_v4 = vcombine.high %v224_v1, %v224_v1  ;;  %s907_s26 = smov 121   ;;  %s908_s8 = smov 120  }
  0x79   : > { %s909_s24 = smov 119   ;;  %s910_s6 = smov 118  }
  0x7a   : > { %239 = vrot.lane.b32.xlu1 %v540_v2, %s901_s0  ;;  %231 = vrot.lane.b32.xlu0 %v540_v2, %s902_s29  ;;  %p542_p7 = scmp.ne.s32.totalorder %s879_s18, 15 }
  0x7b   : > { %v408_v1 = vld [vmem:[%s1226_s2] sm:$0xff] (!%p542_p7) }
  0x7e   : > { %241 = vrot.lane.b32.xlu1 %v541_v4, %s901_s0  ;;  %233 = vrot.lane.b32.xlu0 %v541_v4, %s902_s29  ;;  %s911_s0 = smov 117   ;;  %s912_s29 = smov 116  }
  0x82   : > { %249 = vrot.lane.b32.xlu1 %v541_v4, %s903_s23  ;;  %247 = vrot.lane.b32.xlu0 %v540_v2, %s903_s23  ;;  %s913_s23 = smov 115  }
  0x86   : > { %257 = vrot.lane.b32.xlu1 %v541_v4, %s904_s4  ;;  %255 = vrot.lane.b32.xlu0 %v540_v2, %s904_s4  ;;  %s914_s4 = smov 114  }
  0x8a   : > { %265 = vrot.lane.b32.xlu1 %v541_v4, %s905_s7  ;;  %263 = vrot.lane.b32.xlu0 %v540_v2, %s905_s7  ;;  %s916_s7 = smov 113  }
  0x8e   : > { %273 = vrot.lane.b32.xlu1 %v541_v4, %s906_s27  ;;  %271 = vrot.lane.b32.xlu0 %v540_v2, %s906_s27 }
  0x92   : > { %281 = vrot.lane.b32.xlu1 %v541_v4, %s907_s26  ;;  %279 = vrot.lane.b32.xlu0 %v540_v2, %s907_s26 }
  0x96   : > { %289 = vrot.lane.b32.xlu1 %v541_v4, %s908_s8  ;;  %287 = vrot.lane.b32.xlu0 %v540_v2, %s908_s8 }
  0x9a   : > { %297 = vrot.lane.b32.xlu1 %v541_v4, %s909_s24  ;;  %295 = vrot.lane.b32.xlu0 %v540_v2, %s909_s24 }
  0x9e   : > { %305 = vrot.lane.b32.xlu1 %v541_v4, %s910_s6  ;;  %303 = vrot.lane.b32.xlu0 %v540_v2, %s910_s6 }
  0xa2   : > { %313 = vrot.lane.b32.xlu1 %v541_v4, %s911_s0  ;;  %311 = vrot.lane.b32.xlu0 %v540_v2, %s911_s0 }
  0xa6   : > { %321 = vrot.lane.b32.xlu1 %v541_v4, %s912_s29  ;;  %319 = vrot.lane.b32.xlu0 %v540_v2, %s912_s29 }
  0xaa   : > { %329 = vrot.lane.b32.xlu1 %v541_v4, %s913_s23  ;;  %327 = vrot.lane.b32.xlu0 %v540_v2, %s913_s23 }
  0xae   : > { %337 = vrot.lane.b32.xlu1 %v541_v4, %s914_s4  ;;  %335 = vrot.lane.b32.xlu0 %v540_v2, %s914_s4 }
  0xb2   : > { %345 = vrot.lane.b32.xlu1 %v541_v4, %s916_s7  ;;  %343 = vrot.lane.b32.xlu0 %v540_v2, %s916_s7  ;;  %v917_v2 = vmov (!%p542_p7), 0  }
  0xb3   : > { %710 = vset.pattern.permute.xlu0 (!%p542_p7), %v917_v2 }
  0xb6   : > { %411 = vperm.xlu0 (!%p542_p7), %710, %v408_v1  }
  0xec   : > { %v240_v5 = vpop.permute.xlu1 %239  ;;  %v232_v6 = vpop.permute.xlu0 %231 }
  0xf0   : > { %v242_v7 = vpop.permute.xlu1 %241  ;;  %v234_v8 = vpop.permute.xlu0 %233 }
  0xf1   : > { %v244_v9 = vsel %vm243_vm1, %v240_v5, %v242_v7  ;;  %v236_v10 = vsel %vm235_vm2, %v232_v6, %v234_v8 }
  0xf2   : > { %246 = vst [vmem:[#allocation2 + $0x8] sm:$0xf] %v244_v9  ;;  %238 = vst [vmem:[#allocation2] sm:$0xf0] %v236_v10 }
  0xf4   : > { %v250_v11 = vpop.permute.xlu1 %249  ;;  %v248_v12 = vpop.permute.xlu0 %247 }
  0xf5   : > { %v252_v13 = vsel %vm251_vm3, %v248_v12, %v250_v11 }
  0xf6   : > { %254 = vst [vmem:[#allocation2 + $0x8] sm:$0xf0] %v252_v13 }
  0xf8   : > { %v258_v14 = vpop.permute.xlu1 %257  ;;  %v256_v15 = vpop.permute.xlu0 %255 }
  0xf9   : > { %v260_v16 = vsel %vm259_vm4, %v256_v15, %v258_v14  ;;  %v353_v17 = vld [vmem:[#allocation2] sm:$0xff] }
  0xfa   : > { %262 = vst [vmem:[#allocation2 + $0x10] sm:$0xf] %v260_v16  ;;  %557 = vmatpush3.bf16.msra.mxu0 %v353_v17 }
  0xfb   : > { %558 = vmatprep.subr.bf16.mxu0 %v900_v3 }
  0xfc   : > { %v266_v18 = vpop.permute.xlu1 %265  ;;  %v264_v19 = vpop.permute.xlu0 %263 }
  0xfd   : > { %v268_v20 = vsel %vm267_vm5, %v264_v19, %v266_v18  ;;  %v354_v21 = vld [vmem:[#allocation2 + $0x8] sm:$0xff] }
  0xfe   : > { %270 = vst [vmem:[#allocation2 + $0x10] sm:$0xf0] %v268_v20  ;;  %559 = vmatpush3.bf16.msra.mxu0 %v354_v21 }
  0xff   : > { %560 = vmatprep.subr.bf16.mxu0 %v900_v3 }
 0x100   : > { %v274_v22 = vpop.permute.xlu1 %273  ;;  %v272_v23 = vpop.permute.xlu0 %271 }
 0x101   : > { %v276_v24 = vsel %vm275_vm6, %v272_v23, %v274_v22 }
 0x102   : > { %278 = vst [vmem:[#allocation2 + $0x18] sm:$0xf] %v276_v24 }
 0x104   : > { %v282_v25 = vpop.permute.xlu1 %281  ;;  %v280_v26 = vpop.permute.xlu0 %279 }
 0x105   : > { %v284_v27 = vsel %vm283_vm7, %v280_v26, %v282_v25  ;;  %v355_v28 = vld [vmem:[#allocation2 + $0x10] sm:$0xff] }
 0x106   : > { %286 = vst [vmem:[#allocation2 + $0x18] sm:$0xf0] %v284_v27  ;;  %561 = vmatpush3.bf16.msra.mxu0 %v355_v28 }
 0x107   : > { %562 = vmatprep.subr.bf16.mxu0 %v900_v3 }
 0x108   : > { %v290_v29 = vpop.permute.xlu1 %289  ;;  %v288_v30 = vpop.permute.xlu0 %287 }
 0x109   : > { %v292_v31 = vsel %vm291_vm8, %v288_v30, %v290_v29 }
 0x10a   : > { %294 = vst [vmem:[#allocation2 + $0x20] sm:$0xf] %v292_v31 }
 0x10c   : > { %v298_v32 = vpop.permute.xlu1 %297  ;;  %v296_v33 = vpop.permute.xlu0 %295 }
 0x10d   : > { %v300_v34 = vsel %vm299_vm9, %v296_v33, %v298_v32  ;;  %v356_v35 = vld [vmem:[#allocation2 + $0x18] sm:$0xff] }
 0x10e   : > { %302 = vst [vmem:[#allocation2 + $0x20] sm:$0xf0] %v300_v34  ;;  %563 = vmatpush3.bf16.msra.mxu0 %v356_v35 }
 0x10f   : > { %564 = vmatprep.subr.bf16.mxu0 %v900_v3 }
 0x110   : > { %v306_v36 = vpop.permute.xlu1 %305  ;;  %v304_v37 = vpop.permute.xlu0 %303 }
 0x111   : > { %v308_v38 = vsel %vm307_vm10, %v304_v37, %v306_v36 }
 0x112   : > { %310 = vst [vmem:[#allocation2 + $0x28] sm:$0xf] %v308_v38 }
 0x114   : > { %v314_v39 = vpop.permute.xlu1 %313  ;;  %v312_v40 = vpop.permute.xlu0 %311 }
 0x115   : > { %v316_v41 = vsel %vm315_vm11, %v312_v40, %v314_v39  ;;  %v357_v42 = vld [vmem:[#allocation2 + $0x20] sm:$0xff] }
 0x116   : > { %318 = vst [vmem:[#allocation2 + $0x28] sm:$0xf0] %v316_v41  ;;  %565 = vmatpush3.bf16.msra.mxu0 %v357_v42 }
 0x117   : > { %566 = vmatprep.subr.bf16.mxu0 %v900_v3 }
 0x118   : > { %v322_v43 = vpop.permute.xlu1 %321  ;;  %v320_v44 = vpop.permute.xlu0 %319 }
 0x119   : > { %v324_v45 = vsel %vm323_vm12, %v320_v44, %v322_v43 }
 0x11a   : > { %326 = vst [vmem:[#allocation2 + $0x30] sm:$0xf] %v324_v45 }
 0x11c   : > { %v330_v46 = vpop.permute.xlu1 %329  ;;  %v328_v47 = vpop.permute.xlu0 %327 }
 0x11d   : > { %v332_v48 = vsel %vm331_vm13, %v328_v47, %v330_v46  ;;  %v358_v49 = vld [vmem:[#allocation2 + $0x28] sm:$0xff] }
 0x11e   : > { %334 = vst [vmem:[#allocation2 + $0x30] sm:$0xf0] %v332_v48  ;;  %567 = vmatpush3.bf16.msra.mxu0 %v358_v49 }
 0x11f   : > { %568 = vmatprep.subr.bf16.mxu0 %v900_v3 }
 0x120   : > { %v338_v50 = vpop.permute.xlu1 %337  ;;  %v336_v51 = vpop.permute.xlu0 %335 }
 0x121   : > { %v340_v52 = vsel %vm339_vm14, %v336_v51, %v338_v50 }
 0x122   : > { %342 = vst [vmem:[#allocation2 + $0x38] sm:$0xf] %v340_v52 }
 0x124   : > { %v346_v53 = vpop.permute.xlu1 %345  ;;  %v344_v54 = vpop.permute.xlu0 %343 }
 0x125   : > { %v348_v55 = vsel %vm347_vm15, %v344_v54, %v346_v53  ;;  %v359_v56 = vld [vmem:[#allocation2 + $0x30] sm:$0xff] }
 0x126   : > { %350 = vst [vmem:[#allocation2 + $0x38] sm:$0xf0] %v348_v55  ;;  %569 = vmatpush3.bf16.msra.mxu0 %v359_v56 }
 0x127   : > { %570 = vmatprep.subr.bf16.mxu0 %v900_v3 }
 0x12d   : > { %v360_v57 = vld [vmem:[#allocation2 + $0x38] sm:$0xff] }
 0x12e   : > { %571 = vmatpush3.bf16.msra.mxu0 %v360_v57 }
 0x131   : > { %573 = vmatmul.mubr.bf16.vlgmr.msra.gmra.mrb[0].mxu0 %v352_v58 }
 0x135   : > { %v412_v4 = vpop.permute.xlu0 (!%p542_p7), %411 }
 0x201   : > { %406 = sbr.rel (%p542_p7) target bundleno = 530 (0x212), region = 48 }
 0x204   : > { %v395_v60 = vpop.f32.mrb[0].mxu0 }
 0x205   : > { %v401_v61 = vadd.f32 %v395_v60, %v351_v59  ;;  %v574_v62 = vpop.f32.mrb[1].mxu0 }
 0x206   : > { %v398_v63 = vpop.f32.mrb[2].mxu0 }
 0x207   : > { %402 = vst [vmem:[%s1133_s25] sm:$0xff] %v401_v61  ;;  %v575_v0 = vpop.f32.mrb[3].mxu0 }
 0x20e   : > { %v407_v3 = vld [vmem:[%s1133_s25] sm:$0xff] }
 0x20f   : > { %v414_v5 = vadd.f32 %v412_v4, %v407_v3 }
 0x211   : > { %415 = vst [vmem:[%s1133_s25] sm:$0xff] %v414_v5 }
 0x212 PF: > { %s1165_s18 = scalar_lea.hbm %s1227_s3, %s537_s11  ;;  %s430_s8 = sshll.u32 %s1133_s25, 4  ;;  %s431_s8 = int_to_ptr.vmem [resolvable:$true] %s430_s8 }
 0x213   : > { %s417_s24 = scalar_lea.sflag [#allocation5], %s208_s30  ;;  %s769_s6 = scalar_lea.vmem %s431_s8, 128 }
 0x214   : > { %p770_p9 = scmp.ne.s32.totalorder %s431_s8, %s769_s6  ;;  %p1252_p11 = scmp.ne.s32.totalorder %s1239_s28, 0 }
 0x215   : > { %s918_s0 = smov [#allocation8]  }
 0x216   : > { %p771_p0 = pnand %p770_p9, %p1252_p11  ;;  %s773_s29 = sshll.u32 %s918_s0, 4  ;;  %s774_s29 = int_to_ptr.vmem [resolvable:$false] %s773_s29 }
 0x217   : > { %s775_s19 = scalar_lea.vmem %s774_s29, 256  ;;  %p776_p2 = scmp.lt.s32.totalorder %s431_s8, %s774_s29 }
 0x218   : > { %p772_p13 = pneg %p771_p0  ;;  %p777_p5 = scmp.lt.s32.totalorder %s775_s19, %s769_s6 }
 0x21a   : > { %p778_p8 = por %p777_p5, %p776_p2 }
 0x21c   : > { %p779_p12 = pnand %p778_p8, %p772_p13 }
 0x21e   : > { %782 = shalt.err (!%p779_p12)
}
 0x21f   : > { %s783_s30 = scalar_lea.hbm %s1165_s18, 128  ;;  %s787_s23 = scalar_lea.hbm %s1227_s3, 1152 }
 0x220   : > { %p784_p3 = scmp.ne.s32.totalorder %s1165_s18, %s783_s30  ;;  %p788_p1 = scmp.lt.u32.totalorder %s1165_s18, %s1227_s3 }
 0x221   : > { %p789_p4 = scmp.lt.u32.totalorder %s787_s23, %s783_s30  ;;  %p791_p9 = scmp.lt.u32.totalorder %s783_s30, %s1165_s18 }
 0x222   : > { %p785_p10 = pnand %p784_p3, %p1252_p11 }
 0x223   : > { %p790_p7 = por %p789_p4, %p788_p1 }
 0x224   : > { %p786_p6 = pneg %p785_p10 }
 0x225   : > { %p792_p0 = por %p791_p9, %p790_p7 }
 0x227   : > { %p793_p13 = pnand %p792_p0, %p786_p6 }
 0x229   : > { %796 = shalt.err (!%p793_p13)
}
 0x22a   : > { %582 = dma.vmem_to_hbm [thread:$0]  (%p1252_p11), %s431_s8, 128, %s1165_s18, %s417_s24  }
 0x22b PF: > { %s1253_s27 = sld [smem:[#allocation12_spill]]  ;;  %p599_p2 = scmp.ge.s32.totalorder %s895_s22, 2 }
 0x22c   : > { %s442_s26 = sand.u32 1, %s855_s12  }
 0x22d   : > { %s443_s15 = scalar_lea.sflag [#allocation5], %s442_s26 }
 0x231   : > { %p1254_p5 = scmp.ne.s32.totalorder %s1253_s27, 0 }
 0x233   : > { %p593_p8 = pnand %p599_p2, %p1254_p5 }
 0x235   : > { %850 = dma.done.wait (!%p593_p8), %s443_s15, 128  }
 0x236   : > { %852 = vsyncadd (!%p593_p8), %s443_s15, 4294967168  ;;  %s20_s22 = sadd.s32 1, %s895_s22   ;;  %s1255_s28 = sld [smem:[#allocation13_spill]] }
 0x237   : > { %p17_p12 = scmp.ge.s32.totalorder %s20_s22, 146   ;;  %s1256_s10 = sld [smem:[#allocation14_spill]] }
 0x238   : > { %s1257_s12 = smov %s859_s13  ;;  %s1258_s13 = smov %s863_s14 }
 0x239   : > { %s1259_s14 = smov %s1076_s9  ;;  %s1260_s15 = smov %s871_s16 }
 0x23a   : > { %s1261_s16 = smov %s875_s17  ;;  %s1262_s17 = smov %s1067_s5 }
 0x23b   : > { %s1263_s18 = smov %s887_s20  ;;  %s1264_s19 = smov %s891_s21 }
 0x23c   : > { %s1265_s20 = smov %s1255_s28  ;;  %19 = sbr.rel (!%p17_p12) target bundleno = 12 (0xc), region = 91 }
 0x23d   : > { %s1266_s21 = smov %s1256_s10 }
 0x243   :  { %448 = vsyncpa [#allocation4], 1 }
 0x244   :  { %450 = vsyncpa [#allocation4 + $0x1], 1 }
 0x245   :  { %451 = vsyncpa [#allocation7], 1 }
 0x246   :  { %453 = vsyncpa [#allocation7 + $0x1], 1 }
 0x247   :  { %454 = vsyncpa [#allocation5], 1 }
 0x248   :  { %456 = vsyncpa [#allocation5 + $0x1], 1 }

</bundles_post_ra>
